<compile_context>
chip_gen: v6e
topology: v6e:2x2x1
jax: 0.10.0
libtpu: 0.0.40
codegen_flags: <defaults>
</compile_context>

<pallas_src>
import functools

import numpy as np
import jax
import jax.numpy as jnp
from jax import lax
from jax.experimental import pallas as pl
from jax.experimental.pallas import tpu as pltpu

# ---- synthetic cfg constants (deterministic, in-script) ----
BBOX_NORMALIZE_MEANS = (0.0, 0.0, 0.0, 0.0)
BBOX_NORMALIZE_STDS = (0.1, 0.1, 0.2, 0.2)
BBOX_NORMALIZE_TARGETS_PRECOMPUTED = True
FG_THRESH = 0.5
DCR_SAMPLE_PER_IMAGE = -1  # -> deterministic (blob, label) branch of forward()
# TODO(synk): the DCR.SAMPLE_PER_IMAGE != -1 branch (sample_rois_fg_bg / sample_rois_random /
# sample_rcnn: random, dynamic-length keep/pad index resampling) has no static-shape Pallas
# equivalent and is not implemented.

_MAX_TILE_N = 256  # ROI tile cap (vreg-pressure safe); sweep 256/512/1024 per generation


def _round_up(x, m):
    return ((x + m - 1) // m) * m


def _pick_tile(n):
    if n <= _MAX_TILE_N:
        return n  # single block; all block dims equal full dims -> always legal
    # >= 2 grid blocks for v7x's two TensorCores; lane-dim tiles must be multiples of 128
    # because the outputs keep N on the lane axis.
    return min(_MAX_TILE_N, _round_up(pl.cdiv(n, 2), 128))


def _const4(vals, idx_col):
    """(4,1) column built from 4 python floats using only scalar constants + iota."""
    v0, v1, v2, v3 = (float(v) for v in vals)
    return jnp.where(idx_col < 2,
                     jnp.where(idx_col < 1, v0, v1),
                     jnp.where(idx_col < 3, v2, v3))


def dcr_target_kernel(im_ref, roi_ref, cls_ref, bbox_ref, gt_ref,
                      blob_ref, label_ref, *, class_agnostic):
    f32 = jnp.float32
    bbox = bbox_ref[...].astype(f32)                         # (TN, 4C) native layout

    # ---- class-conditional delta gather in the native (TN, 4C) layout ----
    if class_agnostic:
        gathered = bbox                                      # (TN, 4)
    else:
        cls = cls_ref[...].astype(f32)                       # (TN, C) native layout
        c_dim = cls.shape[1]
        lane_c = lax.broadcasted_iota(jnp.int32, cls.shape, 1)
        fg = jnp.where(lane_c >= 1, cls, -jnp.inf)           # drop background column 0
        m = jnp.max(fg, axis=1, keepdims=True)               # (TN, 1)
        # first-occurrence argmax over fg classes (matches np.argmax), kept in f32
        fg_idx = jnp.min(
            jnp.where((fg == m) & (lane_c >= 1),
                      (lane_c - 1).astype(f32), float(c_dim)),
            axis=1, keepdims=True)                           # (TN, 1)
        lane_k = lax.broadcasted_iota(jnp.int32, bbox.shape, 1).astype(f32)
        lo = fg_idx * 4.0
        sel = (lane_k >= lo) & (lane_k < lo + 4.0)           # columns 4*fg .. 4*fg+3
        gathered = jnp.where(sel, bbox, 0.0)                 # (TN, 4C), 4 nonzeros/row

    # Compaction + layout flip in one tiny MXU op:
    #   d[j, r] = sum_k [k % 4 == j] * gathered[r, k]   -> (4, TN) lane-dense
    kdim = gathered.shape[1]
    jj = lax.broadcasted_iota(jnp.int32, (4, kdim), 0)
    kk = lax.broadcasted_iota(jnp.int32, (4, kdim), 1)
    proj = jnp.where(jnp.bitwise_and(kk, 3) == jj, 1.0, 0.0)
    d = lax.dot_general(proj, gathered, (((1,), (1,)), ((), ())),
                        preferred_element_type=f32)          # (4, TN)

    if BBOX_NORMALIZE_TARGETS_PRECOMPUTED:
        j_col = lax.broadcasted_iota(jnp.int32, (4, 1), 0)
        d = d * _const4(BBOX_NORMALIZE_STDS, j_col) + _const4(BBOX_NORMALIZE_MEANS, j_col)
    dx, dy, dw, dh = d[0:1, :], d[1:2, :], d[2:3, :], d[3:4, :]

    # ---- bbox_transform_inv on roi boxes (lane-dense (4, TN)) ----
    r = roi_ref[...].astype(f32)
    x1, y1, x2, y2 = r[0:1, :], r[1:2, :], r[2:3, :], r[3:4, :]
    w = x2 - x1 + 1.0
    h = y2 - y1 + 1.0
    cx = x1 + 0.5 * w
    cy = y1 + 0.5 * h
    pcx = dx * w + cx
    pcy = dy * h + cy
    pw = jnp.exp(dw) * w
    ph = jnp.exp(dh) * h
    px1 = pcx - 0.5 * pw
    py1 = pcy - 0.5 * ph
    px2 = pcx + 0.5 * pw
    py2 = pcy + 0.5 * ph

    # ---- clip_boxes; H-1 / W-1 are SMEM scalars folded into min/max ----
    hm1 = im_ref[0]
    wm1 = im_ref[1]
    px1 = jnp.maximum(jnp.minimum(px1, wm1), 0.0)
    py1 = jnp.maximum(jnp.minimum(py1, hm1), 0.0)
    px2 = jnp.maximum(jnp.minimum(px2, wm1), 0.0)
    py2 = jnp.maximum(jnp.minimum(py2, hm1), 0.0)

    # ---- blob = [zeros; proposals], single lane-dense store ----
    blob_ref[...] = jnp.concatenate(
        [jnp.zeros_like(px1), px1, py1, px2, py2], axis=0)   # (5, TN)

    # ---- pairwise IoU against pre-masked gt boxes: (G, TN) ----
    g = gt_ref[...]                                          # (G, 5) f32, invalid rows sentinel'd
    gx1, gy1 = g[:, 0:1], g[:, 1:2]
    gx2, gy2 = g[:, 2:3], g[:, 3:4]
    gcls = g[:, 4:5]
    iw = jnp.minimum(px2, gx2) - jnp.maximum(px1, gx1) + 1.0
    ih = jnp.minimum(py2, gy2) - jnp.maximum(py1, gy1) + 1.0
    g_area = (gx2 - gx1 + 1.0) * (gy2 - gy1 + 1.0)           # (G, 1)
    b_area = (px2 - px1 + 1.0) * (py2 - py1 + 1.0)           # (1, TN)
    inter = iw * ih
    ua = b_area + g_area - inter
    # Sentinel gt rows guarantee iw <= 0, so inter/ua is never selected for them.
    ov = jnp.where((iw > 0.0) & (ih > 0.0), inter / ua, 0.0)

    # ---- per-ROI best gt: max + first-occurrence argmax over the gt (sublane) axis ----
    g_cnt = ov.shape[0]
    maxes = jnp.max(ov, axis=0, keepdims=True)               # (1, TN)
    gidx = lax.broadcasted_iota(jnp.int32, ov.shape, 0)
    argm = jnp.min(jnp.where(ov == maxes, gidx, g_cnt), axis=0, keepdims=True)
    cls_best = jnp.sum(jnp.where(gidx == argm, gcls, 0.0), axis=0, keepdims=True)

    # The (N, C) overlaps matrix of the reference has at most one nonzero per row, so its
    # row argmax/max are exactly (cls_best, maxes) -> threshold directly (no scatter).
    label_ref[...] = jnp.where((maxes > 0.0) & (maxes >= FG_THRESH),
                               cls_best.astype(jnp.int32), 0)


def dcr_target_layer(rois, cls_prob, bbox_pred, im_info, gt_boxes,
                     num_classes, class_agnostic=False):
    """Wrapper: minimal layout plumbing, then one Pallas call."""
    N = rois.shape[0]
    G = gt_boxes.shape[0]
    C = num_classes
    f32 = jnp.float32

    # rois -> lane-dense (4, N).  Tiny next to bbox_pred, so this transpose stays in the
    # wrapper; dtype cast happens in-kernel.
    roi_boxes_t = jnp.transpose(rois[:, 1:5])

    # gt truncation (rows at/after the first x2 < 0.01) pre-masked to a sentinel row that
    # forces iw <= 0 / ih <= 0 and class 0 -> no gtv input, no NaN path.
    invalid = jnp.cumsum((gt_boxes[:, 2] < 0.01).astype(jnp.int32)) > 0
    sentinel = jnp.array([0.0, 0.0, -2.0, -2.0, 0.0], dtype=f32)
    gt = jnp.where(invalid[:, None], sentinel, gt_boxes.astype(f32))     # (G, 5)

    im = jnp.stack([im_info[0, 0] - 1.0,
                    im_info[0, 1] - 1.0]).astype(f32)                    # (2,) = [H-1, W-1]

    tn = _pick_tile(N)
    grid = (pl.cdiv(N, tn),)   # partial boundary block handled by Pallas (masked writeback)
    bbox_cols = bbox_pred.shape[1]                                       # 4 or 4*C

    kernel = functools.partial(dcr_target_kernel, class_agnostic=class_agnostic)
    blob_t, labels_t = pl.pallas_call(
        kernel,
        out_shape=(jax.ShapeDtypeStruct((5, N), f32),
                   jax.ShapeDtypeStruct((1, N), jnp.int32)),
        grid=grid,
        in_specs=[
            pl.BlockSpec(memory_space=pltpu.MemorySpace.SMEM),     # im: [H-1, W-1] scalars
            pl.BlockSpec((4, tn), lambda i: (0, i)),               # roi boxes, lane-dense
            pl.BlockSpec((tn, C), lambda i: (i, 0)),               # cls_prob, native layout/dtype
            pl.BlockSpec((tn, bbox_cols), lambda i: (i, 0)),       # bbox_pred, native layout/dtype
            pl.BlockSpec((G, 5), lambda i: (0, 0)),                # pre-masked gt boxes
        ],
        out_specs=(
            pl.BlockSpec((5, tn), lambda i: (0, i)),
            pl.BlockSpec((1, tn), lambda i: (0, i)),
        ),
        compiler_params=pltpu.CompilerParams(
            dimension_semantics=("parallel",)),
    )(im, roi_boxes_t, cls_prob, bbox_pred, gt)

    blob = jnp.transpose(blob_t)                                         # (N, 5)
    labels = labels_t[0]                                                 # (N,)
    return blob, labels


def reference_numpy(rois, cls_prob, bbox_pred, im_info, gt_boxes,
                    num_classes, class_agnostic=False):
    """Pure-numpy mirror of the original forward() (SAMPLE_PER_IMAGE == -1 path)."""
    rois = np.asarray(rois, np.float32)
    cls_prob = np.asarray(cls_prob, np.float32)
    bp = np.asarray(bbox_pred, np.float32)
    im = np.asarray(im_info, np.float32)[0, :]
    gt = np.asarray(gt_boxes, np.float32)

    if class_agnostic:
        deltas = bp.copy()
    else:
        fg_idx = np.argmax(cls_prob[:, 1:], axis=1)
        bidx = np.arange(fg_idx.shape[0])
        deltas = np.stack([bp[bidx, fg_idx * 4 + j] for j in range(4)], axis=1)

    zeros = np.where(gt[:, 2] < 0.01)[0]
    if len(zeros) > 0:
        gt = gt[:zeros[0]]

    deltas = deltas * np.array(BBOX_NORMALIZE_STDS, np.float32) + \
        np.array(BBOX_NORMALIZE_MEANS, np.float32)

    boxes = rois[:, 1:5]
    w = boxes[:, 2] - boxes[:, 0] + 1.0
    h = boxes[:, 3] - boxes[:, 1] + 1.0
    cx = boxes[:, 0] + 0.5 * w
    cy = boxes[:, 1] + 0.5 * h
    pcx = deltas[:, 0] * w + cx
    pcy = deltas[:, 1] * h + cy
    pw = np.exp(deltas[:, 2]) * w
    ph = np.exp(deltas[:, 3]) * h
    props = np.stack([pcx - 0.5 * pw, pcy - 0.5 * ph,
                      pcx + 0.5 * pw, pcy + 0.5 * ph], axis=1)
    props[:, 0] = np.maximum(np.minimum(props[:, 0], im[1] - 1), 0)
    props[:, 2] = np.maximum(np.minimum(props[:, 2], im[1] - 1), 0)
    props[:, 1] = np.maximum(np.minimum(props[:, 1], im[0] - 1), 0)
    props[:, 3] = np.maximum(np.minimum(props[:, 3], im[0] - 1), 0)
    blob = np.hstack([np.zeros((props.shape[0], 1), np.float32),
                      props.astype(np.float32)])

    gt_classes = gt[:, -1].astype(np.int64)
    N = blob.shape[0]
    overlaps = np.zeros((N, num_classes), np.float32)
    if gt.shape[0] > 0:
        b = blob[:, 1:]
        g = gt[:, :4]
        iw = np.minimum(b[:, None, 2], g[None, :, 2]) - \
            np.maximum(b[:, None, 0], g[None, :, 0]) + 1
        ih = np.minimum(b[:, None, 3], g[None, :, 3]) - \
            np.maximum(b[:, None, 1], g[None, :, 1]) + 1
        ga = (g[:, 2] - g[:, 0] + 1) * (g[:, 3] - g[:, 1] + 1)
        ba = (b[:, 2] - b[:, 0] + 1) * (b[:, 3] - b[:, 1] + 1)
        inter = iw * ih
        ua = ba[:, None] + ga[None, :] - inter
        ov = np.where((iw > 0) & (ih > 0), inter / ua, 0.0)
        arg = ov.argmax(axis=1)
        mx = ov.max(axis=1)
        I = np.where(mx > 0)[0]
        overlaps[I, gt_classes[arg[I]]] = mx[I]
    roi_max_cls = overlaps.argmax(axis=1)
    roi_max_ov = overlaps.max(axis=1)
    roi_max_cls[np.where(roi_max_ov < FG_THRESH)] = 0
    return blob, roi_max_cls


if __name__ == "__main__":
    key = jax.random.PRNGKey(0)
    N, C, G = 16, 8, 6          # rois, classes, gt boxes
    H, W = 64.0, 64.0
    class_agnostic = False

    k1, k2, k3, k4, k5, k6, k7 = jax.random.split(key, 7)

    # rois: [batch_idx=0, x1, y1, x2, y2]
    rx1 = jax.random.uniform(k1, (N,), minval=0.0, maxval=40.0)
    ry1 = jax.random.uniform(k2, (N,), minval=0.0, maxval=40.0)
    rw = jax.random.uniform(k3, (N,), minval=4.0, maxval=20.0)
    rh = jax.random.uniform(k4, (N,), minval=4.0, maxval=20.0)
    rois = jnp.stack([jnp.zeros((N,)), rx1, ry1, rx1 + rw, ry1 + rh], axis=1)

    cls_prob = jax.nn.softmax(jax.random.normal(k5, (N, C)), axis=-1)
    bbox_pred = 0.5 * jax.random.normal(k6, (N, 4 * C))

    gx1 = jax.random.uniform(k7, (G,), minval=0.0, maxval=40.0)
    gy1 = jax.random.uniform(k1, (G,), minval=0.0, maxval=40.0)
    gw = jax.random.uniform(k2, (G,), minval=8.0, maxval=24.0)
    gh = jax.random.uniform(k3, (G,), minval=8.0, maxval=24.0)
    gcls = jax.random.randint(k4, (G,), minval=1, maxval=C).astype(jnp.float32)
    gt_boxes = jnp.stack([gx1, gy1, gx1 + gw, gy1 + gh, gcls], axis=1)
    # make the last gt box "empty" (x2 < 0.01) to exercise the truncation path
    gt_boxes = gt_boxes.at[G - 1, 2].set(0.005)

    im_info = jnp.array([[H, W, 1.0]], dtype=jnp.float32)

    blob, labels = dcr_target_layer(rois, cls_prob, bbox_pred, im_info,
                                    gt_boxes, num_classes=C,
                                    class_agnostic=class_agnostic)
    blob = jax.block_until_ready(blob)
    labels = jax.block_until_ready(labels)

    blob_ref, labels_ref = reference_numpy(rois, cls_prob, bbox_pred, im_info,
                                           gt_boxes, num_classes=C,
                                           class_agnostic=class_agnostic)
    assert np.allclose(np.asarray(blob), blob_ref, atol=1e-2, rtol=1e-4), \
        "blob mismatch"
    assert np.array_equal(np.asarray(labels), labels_ref.astype(np.int32)), \
        "label mismatch"
    print("KERNEL_OK")
</pallas_src>

<mosaic_0001>
module attributes {stable_mosaic.version = 11 : i64} {
  func.func @dcr_target_kernel(%arg0: i32, %arg1: memref<2xf32, #tpu.memory_space<smem>>, %arg2: memref<4x16xf32, #tpu.memory_space<vmem>>, %arg3: memref<16x8xf32, #tpu.memory_space<vmem>>, %arg4: memref<16x32xf32, #tpu.memory_space<vmem>>, %arg5: memref<6x5xf32, #tpu.memory_space<vmem>>, %arg6: memref<5x16xf32, #tpu.memory_space<vmem>>, %arg7: memref<1x16xi32, #tpu.memory_space<vmem>>) attributes {dimension_semantics = [#tpu.dimension_semantics<parallel>], iteration_bounds = array<i64: 1>, scalar_prefetch = 0 : i64, scratch_operands = 0 : i64, tpu.core_type = #tpu.core_type<tc>, window_params = [{transform_indices = @transform_0, window_bounds = array<i64: 2>}, {transform_indices = @transform_1, window_bounds = array<i64: 4, 16>}, {transform_indices = @transform_2, window_bounds = array<i64: 16, 8>}, {transform_indices = @transform_3, window_bounds = array<i64: 16, 32>}, {pipeline_mode = #tpu.pipeline_mode<synchronous>, transform_indices = @transform_4, window_bounds = array<i64: 6, 5>}, {transform_indices = @transform_5, window_bounds = array<i64: 5, 16>}, {transform_indices = @transform_6, window_bounds = array<i64: 1, 16>}]} {
    %c0 = arith.constant 0 : index
    %c0_0 = arith.constant 0 : index
    %0 = vector.load %arg4[%c0, %c0_0] : memref<16x32xf32, #tpu.memory_space<vmem>>, vector<16x32xf32>
    %c0_1 = arith.constant 0 : index
    %c0_2 = arith.constant 0 : index
    %1 = vector.load %arg3[%c0_1, %c0_2] : memref<16x8xf32, #tpu.memory_space<vmem>>, vector<16x8xf32>
    %2 = tpu.iota {dimensions = array<i32: 1>} : vector<16x8xi32>
    %c1_i32 = arith.constant 1 : i32
    %3 = vector.broadcast %c1_i32 : i32 to vector<16x8xi32>
    %4 = arith.cmpi sge, %2, %3 : vector<16x8xi32>
    %cst = arith.constant 0xFF800000 : f32
    %5 = vector.broadcast %cst : f32 to vector<16x8xf32>
    %6 = arith.select %4, %1, %5 : vector<16x8xi1>, vector<16x8xf32>
    %cst_3 = arith.constant dense<0xFF800000> : vector<16xf32>
    %7 = vector.multi_reduction <maximumf>, %6, %cst_3 [1] : vector<16x8xf32> to vector<16xf32>
    %8 = vector.shape_cast %7 : vector<16xf32> to vector<16x1xf32>
    %9 = vector.broadcast %8 : vector<16x1xf32> to vector<16x8xf32>
    %10 = arith.cmpf oeq, %6, %9 : vector<16x8xf32>
    %c1_i32_4 = arith.constant 1 : i32
    %11 = vector.broadcast %c1_i32_4 : i32 to vector<16x8xi32>
    %12 = arith.cmpi sge, %2, %11 : vector<16x8xi32>
    %13 = arith.andi %10, %12 : vector<16x8xi1>
    %c1_i32_5 = arith.constant 1 : i32
    %14 = vector.broadcast %c1_i32_5 : i32 to vector<16x8xi32>
    %15 = arith.subi %2, %14 : vector<16x8xi32>
    %16 = arith.sitofp %15 : vector<16x8xi32> to vector<16x8xf32>
    %cst_6 = arith.constant 8.000000e+00 : f32
    %17 = vector.broadcast %cst_6 : f32 to vector<16x8xf32>
    %18 = arith.select %13, %16, %17 : vector<16x8xi1>, vector<16x8xf32>
    %cst_7 = arith.constant dense<0x7F800000> : vector<16xf32>
    %19 = vector.multi_reduction <minimumf>, %18, %cst_7 [1] : vector<16x8xf32> to vector<16xf32>
    %20 = vector.shape_cast %19 : vector<16xf32> to vector<16x1xf32>
    %21 = tpu.iota {dimensions = array<i32: 1>} : vector<16x32xi32>
    %22 = arith.sitofp %21 : vector<16x32xi32> to vector<16x32xf32>
    %cst_8 = arith.constant 4.000000e+00 : f32
    %23 = vector.broadcast %cst_8 : f32 to vector<16x1xf32>
    %24 = arith.mulf %20, %23 : vector<16x1xf32>
    %25 = vector.broadcast %24 : vector<16x1xf32> to vector<16x32xf32>
    %26 = arith.cmpf oge, %22, %25 : vector<16x32xf32>
    %cst_9 = arith.constant 4.000000e+00 : f32
    %27 = vector.broadcast %cst_9 : f32 to vector<16x1xf32>
    %28 = arith.addf %24, %27 : vector<16x1xf32>
    %29 = vector.broadcast %28 : vector<16x1xf32> to vector<16x32xf32>
    %30 = arith.cmpf olt, %22, %29 : vector<16x32xf32>
    %31 = arith.andi %26, %30 : vector<16x32xi1>
    %cst_10 = arith.constant 0.000000e+00 : f32
    %32 = vector.broadcast %cst_10 : f32 to vector<16x32xf32>
    %33 = arith.select %31, %0, %32 : vector<16x32xi1>, vector<16x32xf32>
    %34 = tpu.iota {dimensions = array<i32: 0>} : vector<4x32xi32>
    %35 = tpu.iota {dimensions = array<i32: 1>} : vector<4x32xi32>
    %c3_i32 = arith.constant 3 : i32
    %36 = vector.broadcast %c3_i32 : i32 to vector<4x32xi32>
    %37 = arith.andi %35, %36 : vector<4x32xi32>
    %38 = arith.cmpi eq, %37, %34 : vector<4x32xi32>
    %cst_11 = arith.constant 1.000000e+00 : f32
    %cst_12 = arith.constant 0.000000e+00 : f32
    %39 = vector.broadcast %cst_11 : f32 to vector<4x32xf32>
    %40 = vector.broadcast %cst_12 : f32 to vector<4x32xf32>
    %41 = arith.select %38, %39, %40 : vector<4x32xi1>, vector<4x32xf32>
    %cst_13 = arith.constant dense<0.000000e+00> : vector<4x16xf32>
    %42 = tpu.matmul %41, %33, %cst_13 {dimension_numbers = #tpu.dot_dimension_numbers<[1], [1], [0], [0], [0, 0, 1, 0], [], []>} : vector<4x32xf32>, vector<16x32xf32>, vector<4x16xf32> -> vector<4x16xf32>
    %43 = tpu.iota {dimensions = array<i32: 0>} : vector<4x1xi32>
    %c2_i32 = arith.constant 2 : i32
    %44 = vector.broadcast %c2_i32 : i32 to vector<4x1xi32>
    %45 = arith.cmpi slt, %43, %44 : vector<4x1xi32>
    %c1_i32_14 = arith.constant 1 : i32
    %46 = vector.broadcast %c1_i32_14 : i32 to vector<4x1xi32>
    %47 = arith.cmpi slt, %43, %46 : vector<4x1xi32>
    %cst_15 = arith.constant 1.000000e-01 : f32
    %cst_16 = arith.constant 1.000000e-01 : f32
    %48 = vector.broadcast %cst_15 : f32 to vector<4x1xf32>
    %49 = vector.broadcast %cst_16 : f32 to vector<4x1xf32>
    %50 = arith.select %47, %48, %49 : vector<4x1xi1>, vector<4x1xf32>
    %c3_i32_17 = arith.constant 3 : i32
    %51 = vector.broadcast %c3_i32_17 : i32 to vector<4x1xi32>
    %52 = arith.cmpi slt, %43, %51 : vector<4x1xi32>
    %cst_18 = arith.constant 2.000000e-01 : f32
    %cst_19 = arith.constant 2.000000e-01 : f32
    %53 = vector.broadcast %cst_18 : f32 to vector<4x1xf32>
    %54 = vector.broadcast %cst_19 : f32 to vector<4x1xf32>
    %55 = arith.select %52, %53, %54 : vector<4x1xi1>, vector<4x1xf32>
    %56 = arith.select %45, %50, %55 : vector<4x1xi1>, vector<4x1xf32>
    %57 = vector.broadcast %56 : vector<4x1xf32> to vector<4x16xf32>
    %58 = arith.mulf %42, %57 : vector<4x16xf32>
    %c2_i32_20 = arith.constant 2 : i32
    %59 = vector.broadcast %c2_i32_20 : i32 to vector<4x1xi32>
    %60 = arith.cmpi slt, %43, %59 : vector<4x1xi32>
    %c1_i32_21 = arith.constant 1 : i32
    %61 = vector.broadcast %c1_i32_21 : i32 to vector<4x1xi32>
    %62 = arith.cmpi slt, %43, %61 : vector<4x1xi32>
    %cst_22 = arith.constant 0.000000e+00 : f32
    %cst_23 = arith.constant 0.000000e+00 : f32
    %63 = vector.broadcast %cst_22 : f32 to vector<4x1xf32>
    %64 = vector.broadcast %cst_23 : f32 to vector<4x1xf32>
    %65 = arith.select %62, %63, %64 : vector<4x1xi1>, vector<4x1xf32>
    %c3_i32_24 = arith.constant 3 : i32
    %66 = vector.broadcast %c3_i32_24 : i32 to vector<4x1xi32>
    %67 = arith.cmpi slt, %43, %66 : vector<4x1xi32>
    %cst_25 = arith.constant 0.000000e+00 : f32
    %cst_26 = arith.constant 0.000000e+00 : f32
    %68 = vector.broadcast %cst_25 : f32 to vector<4x1xf32>
    %69 = vector.broadcast %cst_26 : f32 to vector<4x1xf32>
    %70 = arith.select %67, %68, %69 : vector<4x1xi1>, vector<4x1xf32>
    %71 = arith.select %60, %65, %70 : vector<4x1xi1>, vector<4x1xf32>
    %72 = vector.broadcast %71 : vector<4x1xf32> to vector<4x16xf32>
    %73 = arith.addf %58, %72 : vector<4x16xf32>
    %74 = vector.extract_strided_slice %73 {offsets = [0, 0], sizes = [1, 16], strides = [1, 1]} : vector<4x16xf32> to vector<1x16xf32>
    %75 = vector.extract_strided_slice %73 {offsets = [1, 0], sizes = [1, 16], strides = [1, 1]} : vector<4x16xf32> to vector<1x16xf32>
    %76 = vector.extract_strided_slice %73 {offsets = [2, 0], sizes = [1, 16], strides = [1, 1]} : vector<4x16xf32> to vector<1x16xf32>
    %77 = vector.extract_strided_slice %73 {offsets = [3, 0], sizes = [1, 16], strides = [1, 1]} : vector<4x16xf32> to vector<1x16xf32>
    %c0_27 = arith.constant 0 : index
    %c0_28 = arith.constant 0 : index
    %78 = vector.load %arg2[%c0_27, %c0_28] : memref<4x16xf32, #tpu.memory_space<vmem>>, vector<4x16xf32>
    %79 = vector.extract_strided_slice %78 {offsets = [0, 0], sizes = [1, 16], strides = [1, 1]} : vector<4x16xf32> to vector<1x16xf32>
    %80 = vector.extract_strided_slice %78 {offsets = [1, 0], sizes = [1, 16], strides = [1, 1]} : vector<4x16xf32> to vector<1x16xf32>
    %81 = vector.extract_strided_slice %78 {offsets = [2, 0], sizes = [1, 16], strides = [1, 1]} : vector<4x16xf32> to vector<1x16xf32>
    %82 = vector.extract_strided_slice %78 {offsets = [3, 0], sizes = [1, 16], strides = [1, 1]} : vector<4x16xf32> to vector<1x16xf32>
    %83 = arith.subf %81, %79 : vector<1x16xf32>
    %cst_29 = arith.constant 1.000000e+00 : f32
    %84 = vector.broadcast %cst_29 : f32 to vector<1x16xf32>
    %85 = arith.addf %83, %84 : vector<1x16xf32>
    %86 = arith.subf %82, %80 : vector<1x16xf32>
    %cst_30 = arith.constant 1.000000e+00 : f32
    %87 = vector.broadcast %cst_30 : f32 to vector<1x16xf32>
    %88 = arith.addf %86, %87 : vector<1x16xf32>
    %cst_31 = arith.constant 5.000000e-01 : f32
    %89 = vector.broadcast %cst_31 : f32 to vector<1x16xf32>
    %90 = arith.mulf %89, %85 : vector<1x16xf32>
    %91 = arith.addf %79, %90 : vector<1x16xf32>
    %cst_32 = arith.constant 5.000000e-01 : f32
    %92 = vector.broadcast %cst_32 : f32 to vector<1x16xf32>
    %93 = arith.mulf %92, %88 : vector<1x16xf32>
    %94 = arith.addf %80, %93 : vector<1x16xf32>
    %95 = arith.mulf %74, %85 : vector<1x16xf32>
    %96 = arith.addf %95, %91 : vector<1x16xf32>
    %97 = arith.mulf %75, %88 : vector<1x16xf32>
    %98 = arith.addf %97, %94 : vector<1x16xf32>
    %99 = math.exp %76 : vector<1x16xf32>
    %100 = arith.mulf %99, %85 : vector<1x16xf32>
    %101 = math.exp %77 : vector<1x16xf32>
    %102 = arith.mulf %101, %88 : vector<1x16xf32>
    %cst_33 = arith.constant 5.000000e-01 : f32
    %103 = vector.broadcast %cst_33 : f32 to vector<1x16xf32>
    %104 = arith.mulf %103, %100 : vector<1x16xf32>
    %105 = arith.subf %96, %104 : vector<1x16xf32>
    %cst_34 = arith.constant 5.000000e-01 : f32
    %106 = vector.broadcast %cst_34 : f32 to vector<1x16xf32>
    %107 = arith.mulf %106, %102 : vector<1x16xf32>
    %108 = arith.subf %98, %107 : vector<1x16xf32>
    %cst_35 = arith.constant 5.000000e-01 : f32
    %109 = vector.broadcast %cst_35 : f32 to vector<1x16xf32>
    %110 = arith.mulf %109, %100 : vector<1x16xf32>
    %111 = arith.addf %96, %110 : vector<1x16xf32>
    %cst_36 = arith.constant 5.000000e-01 : f32
    %112 = vector.broadcast %cst_36 : f32 to vector<1x16xf32>
    %113 = arith.mulf %112, %102 : vector<1x16xf32>
    %114 = arith.addf %98, %113 : vector<1x16xf32>
    %c0_37 = arith.constant 0 : index
    %115 = memref.load %arg1[%c0_37] : memref<2xf32, #tpu.memory_space<smem>>
    %c1 = arith.constant 1 : index
    %116 = memref.load %arg1[%c1] : memref<2xf32, #tpu.memory_space<smem>>
    %117 = vector.broadcast %116 : f32 to vector<1x16xf32>
    %118 = arith.minimumf %105, %117 : vector<1x16xf32>
    %cst_38 = arith.constant 0.000000e+00 : f32
    %119 = vector.broadcast %cst_38 : f32 to vector<1x16xf32>
    %120 = arith.maximumf %118, %119 : vector<1x16xf32>
    %121 = vector.broadcast %115 : f32 to vector<1x16xf32>
    %122 = arith.minimumf %108, %121 : vector<1x16xf32>
    %cst_39 = arith.constant 0.000000e+00 : f32
    %123 = vector.broadcast %cst_39 : f32 to vector<1x16xf32>
    %124 = arith.maximumf %122, %123 : vector<1x16xf32>
    %125 = vector.broadcast %116 : f32 to vector<1x16xf32>
    %126 = arith.minimumf %111, %125 : vector<1x16xf32>
    %cst_40 = arith.constant 0.000000e+00 : f32
    %127 = vector.broadcast %cst_40 : f32 to vector<1x16xf32>
    %128 = arith.maximumf %126, %127 : vector<1x16xf32>
    %129 = vector.broadcast %115 : f32 to vector<1x16xf32>
    %130 = arith.minimumf %114, %129 : vector<1x16xf32>
    %cst_41 = arith.constant 0.000000e+00 : f32
    %131 = vector.broadcast %cst_41 : f32 to vector<1x16xf32>
    %132 = arith.maximumf %130, %131 : vector<1x16xf32>
    %cst_42 = arith.constant 0.000000e+00 : f32
    %133 = vector.broadcast %cst_42 : f32 to vector<1x16xf32>
    %134 = tpu.concatenate %133, %120, %124, %128, %132 in 0 : vector<1x16xf32>, vector<1x16xf32>, vector<1x16xf32>, vector<1x16xf32>, vector<1x16xf32> -> vector<5x16xf32>
    %c0_43 = arith.constant 0 : index
    %c0_44 = arith.constant 0 : index
    %135 = vector.load %arg6[%c0_43, %c0_44] : memref<5x16xf32, #tpu.memory_space<vmem>>, vector<5x16xf32>
    tpu.vector_store %arg6[%c0_43, %c0_44], %134 {strides = array<i32>} : memref<5x16xf32, #tpu.memory_space<vmem>>, vector<5x16xf32>,
    %c0_45 = arith.constant 0 : index
    %c0_46 = arith.constant 0 : index
    %136 = vector.load %arg5[%c0_45, %c0_46] : memref<6x5xf32, #tpu.memory_space<vmem>>, vector<6x5xf32>
    %137 = vector.extract_strided_slice %136 {offsets = [0, 0], sizes = [6, 1], strides = [1, 1]} : vector<6x5xf32> to vector<6x1xf32>
    %138 = vector.extract_strided_slice %136 {offsets = [0, 1], sizes = [6, 1], strides = [1, 1]} : vector<6x5xf32> to vector<6x1xf32>
    %139 = vector.extract_strided_slice %136 {offsets = [0, 2], sizes = [6, 1], strides = [1, 1]} : vector<6x5xf32> to vector<6x1xf32>
    %140 = vector.extract_strided_slice %136 {offsets = [0, 3], sizes = [6, 1], strides = [1, 1]} : vector<6x5xf32> to vector<6x1xf32>
    %141 = vector.extract_strided_slice %136 {offsets = [0, 4], sizes = [6, 1], strides = [1, 1]} : vector<6x5xf32> to vector<6x1xf32>
    %142 = vector.broadcast %128 : vector<1x16xf32> to vector<6x16xf32>
    %143 = vector.broadcast %139 : vector<6x1xf32> to vector<6x16xf32>
    %144 = arith.minimumf %142, %143 : vector<6x16xf32>
    %145 = vector.broadcast %120 : vector<1x16xf32> to vector<6x16xf32>
    %146 = vector.broadcast %137 : vector<6x1xf32> to vector<6x16xf32>
    %147 = arith.maximumf %145, %146 : vector<6x16xf32>
    %148 = arith.subf %144, %147 : vector<6x16xf32>
    %cst_47 = arith.constant 1.000000e+00 : f32
    %149 = vector.broadcast %cst_47 : f32 to vector<6x16xf32>
    %150 = arith.addf %148, %149 : vector<6x16xf32>
    %151 = vector.broadcast %132 : vector<1x16xf32> to vector<6x16xf32>
    %152 = vector.broadcast %140 : vector<6x1xf32> to vector<6x16xf32>
    %153 = arith.minimumf %151, %152 : vector<6x16xf32>
    %154 = vector.broadcast %124 : vector<1x16xf32> to vector<6x16xf32>
    %155 = vector.broadcast %138 : vector<6x1xf32> to vector<6x16xf32>
    %156 = arith.maximumf %154, %155 : vector<6x16xf32>
    %157 = arith.subf %153, %156 : vector<6x16xf32>
    %cst_48 = arith.constant 1.000000e+00 : f32
    %158 = vector.broadcast %cst_48 : f32 to vector<6x16xf32>
    %159 = arith.addf %157, %158 : vector<6x16xf32>
    %160 = arith.subf %139, %137 : vector<6x1xf32>
    %cst_49 = arith.constant 1.000000e+00 : f32
    %161 = vector.broadcast %cst_49 : f32 to vector<6x1xf32>
    %162 = arith.addf %160, %161 : vector<6x1xf32>
    %163 = arith.subf %140, %138 : vector<6x1xf32>
    %cst_50 = arith.constant 1.000000e+00 : f32
    %164 = vector.broadcast %cst_50 : f32 to vector<6x1xf32>
    %165 = arith.addf %163, %164 : vector<6x1xf32>
    %166 = arith.mulf %162, %165 : vector<6x1xf32>
    %167 = arith.subf %128, %120 : vector<1x16xf32>
    %cst_51 = arith.constant 1.000000e+00 : f32
    %168 = vector.broadcast %cst_51 : f32 to vector<1x16xf32>
    %169 = arith.addf %167, %168 : vector<1x16xf32>
    %170 = arith.subf %132, %124 : vector<1x16xf32>
    %cst_52 = arith.constant 1.000000e+00 : f32
    %171 = vector.broadcast %cst_52 : f32 to vector<1x16xf32>
    %172 = arith.addf %170, %171 : vector<1x16xf32>
    %173 = arith.mulf %169, %172 : vector<1x16xf32>
    %174 = arith.mulf %150, %159 : vector<6x16xf32>
    %175 = vector.broadcast %173 : vector<1x16xf32> to vector<6x16xf32>
    %176 = vector.broadcast %166 : vector<6x1xf32> to vector<6x16xf32>
    %177 = arith.addf %175, %176 : vector<6x16xf32>
    %178 = arith.subf %177, %174 : vector<6x16xf32>
    %cst_53 = arith.constant 0.000000e+00 : f32
    %179 = vector.broadcast %cst_53 : f32 to vector<6x16xf32>
    %180 = arith.cmpf ogt, %150, %179 : vector<6x16xf32>
    %cst_54 = arith.constant 0.000000e+00 : f32
    %181 = vector.broadcast %cst_54 : f32 to vector<6x16xf32>
    %182 = arith.cmpf ogt, %159, %181 : vector<6x16xf32>
    %183 = arith.andi %180, %182 : vector<6x16xi1>
    %184 = arith.divf %174, %178 : vector<6x16xf32>
    %cst_55 = arith.constant 0.000000e+00 : f32
    %185 = vector.broadcast %cst_55 : f32 to vector<6x16xf32>
    %186 = arith.select %183, %184, %185 : vector<6x16xi1>, vector<6x16xf32>
    %cst_56 = arith.constant dense<0xFF800000> : vector<16xf32>
    %187 = vector.multi_reduction <maximumf>, %186, %cst_56 [0] : vector<6x16xf32> to vector<16xf32>
    %188 = vector.shape_cast %187 : vector<16xf32> to vector<1x16xf32>
    %189 = tpu.iota {dimensions = array<i32: 0>} : vector<6x16xi32>
    %190 = vector.broadcast %188 : vector<1x16xf32> to vector<6x16xf32>
    %191 = arith.cmpf oeq, %186, %190 : vector<6x16xf32>
    %c6_i32 = arith.constant 6 : i32
    %192 = vector.broadcast %c6_i32 : i32 to vector<6x16xi32>
    %193 = arith.select %191, %189, %192 : vector<6x16xi1>, vector<6x16xi32>
    %cst_57 = arith.constant dense<2147483647> : vector<16xi32>
    %194 = vector.multi_reduction <minsi>, %193, %cst_57 [0] : vector<6x16xi32> to vector<16xi32>
    %195 = vector.shape_cast %194 : vector<16xi32> to vector<1x16xi32>
    %196 = vector.broadcast %195 : vector<1x16xi32> to vector<6x16xi32>
    %197 = arith.cmpi eq, %189, %196 : vector<6x16xi32>
    %cst_58 = arith.constant 0.000000e+00 : f32
    %198 = vector.shape_cast %141 : vector<6x1xf32> to vector<6x1xf32>
    %199 = vector.broadcast %198 : vector<6x1xf32> to vector<6x16xf32>
    %200 = vector.broadcast %cst_58 : f32 to vector<6x16xf32>
    %201 = arith.select %197, %199, %200 : vector<6x16xi1>, vector<6x16xf32>
    %cst_59 = arith.constant dense<0.000000e+00> : vector<16xf32>
    %202 = vector.multi_reduction <add>, %201, %cst_59 [0] : vector<6x16xf32> to vector<16xf32>
    %203 = vector.shape_cast %202 : vector<16xf32> to vector<1x16xf32>
    %cst_60 = arith.constant 0.000000e+00 : f32
    %204 = vector.broadcast %cst_60 : f32 to vector<1x16xf32>
    %205 = arith.cmpf ogt, %188, %204 : vector<1x16xf32>
    %cst_61 = arith.constant 5.000000e-01 : f32
    %206 = vector.broadcast %cst_61 : f32 to vector<1x16xf32>
    %207 = arith.cmpf oge, %188, %206 : vector<1x16xf32>
    %208 = arith.andi %205, %207 : vector<1x16xi1>
    %209 = arith.fptosi %203 : vector<1x16xf32> to vector<1x16xi32>
    %c0_i32 = arith.constant 0 : i32
    %210 = vector.broadcast %c0_i32 : i32 to vector<1x16xi32>
    %211 = arith.select %208, %209, %210 : vector<1x16xi1>, vector<1x16xi32>
    %c0_62 = arith.constant 0 : index
    %c0_63 = arith.constant 0 : index
    %212 = vector.load %arg7[%c0_62, %c0_63] : memref<1x16xi32, #tpu.memory_space<vmem>>, vector<1x16xi32>
    tpu.vector_store %arg7[%c0_62, %c0_63], %211 {strides = array<i32>} : memref<1x16xi32, #tpu.memory_space<vmem>>, vector<1x16xi32>,
    return
  }
  func.func @transform_0(%arg0: i32) -> i32 {
    %c0_i32 = arith.constant 0 : i32
    %c0_i32_0 = arith.constant 0 : i32
    return %c0_i32 : i32
  }
  func.func @transform_1(%arg0: i32) -> (i32, i32) {
    %c0_i32 = arith.constant 0 : i32
    %c0_i32_0 = arith.constant 0 : i32
    return %c0_i32, %arg0 : i32, i32
  }
  func.func @transform_2(%arg0: i32) -> (i32, i32) {
    %c0_i32 = arith.constant 0 : i32
    %c0_i32_0 = arith.constant 0 : i32
    return %arg0, %c0_i32 : i32, i32
  }
  func.func @transform_3(%arg0: i32) -> (i32, i32) {
    %c0_i32 = arith.constant 0 : i32
    %c0_i32_0 = arith.constant 0 : i32
    return %arg0, %c0_i32 : i32, i32
  }
  func.func @transform_4(%arg0: i32) -> (i32, i32) {
    %c0_i32 = arith.constant 0 : i32
    %c0_i32_0 = arith.constant 0 : i32
    %c0_i32_1 = arith.constant 0 : i32
    return %c0_i32, %c0_i32_0 : i32, i32
  }
  func.func @transform_5(%arg0: i32) -> (i32, i32) {
    %c0_i32 = arith.constant 0 : i32
    %c0_i32_0 = arith.constant 0 : i32
    return %c0_i32, %arg0 : i32, i32
  }
  func.func @transform_6(%arg0: i32) -> (i32, i32) {
    %c0_i32 = arith.constant 0 : i32
    %c0_i32_0 = arith.constant 0 : i32
    return %c0_i32, %arg0 : i32, i32
  }
}

</mosaic_0001>

<bundles_post_ra>
// kernel: tpu_custom_call.1
= control target key start
LH: loop header
LB: loop body
LE: loop exit
PB: predicated region body
PF: predicated region fallthrough
CT: control target
= control target key end

     0   :  { %12 = vsyncpa [#allocation4], 0  ;;  %s584_s0 = inlined_call_operand.vmem [shape: f32[2], index: 0, kind: input, shape index: {}]   ;;  %s585_s1 = inlined_call_operand.vmem [shape: f32[4,16], index: 1, kind: input, shape index: {}]   ;;  %s586_s2 = inlined_call_operand.vmem [shape: f32[16,8], index: 2, kind: input, shape index: {}]   ;;  %s587_s3 = inlined_call_operand.vmem [shape: f32[16,32], index: 3, kind: input, shape index: {}]   ;;  %s588_s4 = inlined_call_operand.vmem [shape: f32[6,5], index: 4, kind: input, shape index: {}]   ;;  %s589_s5 = inlined_call_operand.hbm [shape: f32[5,16], index: 5, kind: output, shape index: {0}]   ;;  %s590_s6 = inlined_call_operand.hbm [shape: s32[1,16], index: 6, kind: output, shape index: {1}]  }
   0x1   :  { %13 = vsyncpa [#allocation3], 0 }
   0x2   :  { %14 = vsyncpa [#allocation7], 0  ;;  %s21_s23 = sshll.u32 %s584_s0, 4  ;;  %s22_s23 = int_to_ptr.vmem [resolvable:$true] %s21_s23 }
   0x3   :  { %s415_s24 = scalar_lea.vmem %s22_s23, 16  ;;  %p420_p1 = scmp.lt.s32.totalorder %s22_s23, %s22_s23 }
   0x4   :  { %p416_p0 = scmp.ne.s32.totalorder %s22_s23, %s415_s24  ;;  %p421_p2 = scmp.lt.s32.totalorder %s415_s24, %s415_s24 }
   0x6   :  { %p422_p3 = por %p421_p2, %p420_p1 }
   0x8   :  { %p423_p4 = pnand %p422_p3, %p416_p0 }
   0xa   :  { %426 = shalt.err (!%p423_p4)
}
   0xb   :  { %s473_s25 = smov [#allocation2]  }
   0xc   :  { %24 = dma.vmem_to_smem %s22_s23, 16, %s473_s25, [#allocation4]  }
   0xd   :  { %467 = dma.done.wait [#allocation4], 16  }
   0xe   :  { %468 = vsyncadd [#allocation4], 4294967280 }
   0xf   :  { %36 = sfence }
  0x10   :  { %v41_v0 = vlaneseq  ;;  %v40_v1 = vld [vmem:[%s586_s2 + $0x8] sm:$0xff]  ;;  %v39_v3 = vld [vmem:[%s586_s2] sm:$0xff]  ;;  %vm46_vm0 = vcmask 64512   ;;  %s474_s2 = smov 2   ;;  %v475_v9 = vmov 2   ;;  %v476_v20 = vmov 0.0  }
  0x11   :  { %v228_v8 = vld [vmem:[%s588_s4] sm:$0x3f]  ;;  %405 = vset.pattern.permute.xlu1 %v475_v9  ;;  %383 = vmatprep.subr.mxu0 %v476_v20  ;;  %s477_s4 = smov 127   ;;  %vm478_vm6 = vmmov 0   ;;  %v479_v22 = vmov 3   ;;  %v480_v23 = vmov 0  }
  0x12   :  { %v527_v2 = vand.u32 127, %v41_v0  ;;  %387 = vmatprep.mubr.msk.f32.mxu0 %vm478_vm6, %v476_v20  ;;  %407 = vset.pattern.permute.xlu0 %v479_v22  ;;  %v481_v24 = vmov 1   ;;  %v550_v29 = vshrl.u32 %v41_v0, 7  ;;  %v38_v31 = vld [vmem:[%s587_s3 + $0x8] sm:$0xff]  ;;  %vm85_vm7 = vcmask 261120   ;;  %v37_v38 = vld [vmem:[%s587_s3] sm:$0xff] }
  0x13   :  { %v482_v36 = vmov 4   ;;  %v169_v42 = vld [vmem:[%s585_s1] sm:$0xf]  ;;  %v483_v43 = vmov 0.2   ;;  %s194_s3 = sld [smem:[#allocation2]] }
  0x14   :  { %vm43_vm1 = vcmp.ge.s32.totalorder %v527_v2, 1  ;;  %v375_v10 = vadd.s32 4294967295, %v527_v2  ;;  %v67_v26 = vcvt.s32.f32 %v527_v2  ;;  %v82_v33 = vand.u32 3, %v527_v2  ;;  %s379_s13 = sld [smem:[#allocation2 + $0x1]]  ;;  %s484_s1 = smov [#allocation5]  }
  0x15   :  { %v45_v4 = vsel %vm43_vm1, %v40_v1, -inf  ;;  %v44_v5 = vsel %vm43_vm1, %v39_v3, -inf  ;;  %vm165_vm15 = vcmp.lt.s32.totalorder %v550_v29, 2  ;;  %v171_v45 = vrot.slane %v169_v42, 6  ;;  %s352_s14 = sshll.u32 %s484_s1, 4  ;;  %s353_s14 = int_to_ptr.vmem [resolvable:$true] %s352_s14 }
  0x16   :  { %v50_v6 = vsel %vm46_vm0, %v45_v4, -inf  ;;  %v47_v7 = vsel %vm46_vm0, %v44_v5, -inf  ;;  %v58_v11 = vcvt.s32.f32 %v375_v10  ;;  %vm83_vm13 = vcmp.eq.s32.totalorder %v82_v33, %v550_v29  ;;  %s427_s15 = scalar_lea.vmem %s353_s14, 128  ;;  %p432_p6 = scmp.lt.s32.totalorder %s353_s14, %s353_s14 }
  0x17   :  { %51 = vmax.xlane.f32.xlu0 %v50_v6  ;;  %v84_v41 = vsel %vm83_vm13, 1.0, %v476_v20  ;;  %v166_v44 = vsel %vm165_vm15, 0.1, %v483_v43  ;;  %v173_v49 = vsub.f32 %v169_v42, %v171_v45  ;;  %v231_v3 = vsub.s32 0, %v550_v29  ;;  %p428_p5 = scmp.ne.s32.totalorder %s353_s14, %s427_s15  ;;  %p433_p7 = scmp.lt.s32.totalorder %s427_s15, %s427_s15 }
  0x19   :  { %v174_v51 = vadd.f32 1.0, %v173_v49  ;;  %v199_v0 = vstv %s194_s3  ;;  %p434_p8 = por %p433_p7, %p432_p6 }
  0x1a   :  { %v196_v63 = vstv %s379_s13 }
  0x1b   :  { %48 = vmax.xlane.f32.xlu0 %v47_v7  ;;  %v175_v52 = vmul.f32 0.5, %v174_v51  ;;  %v181_v54 = vrot.slane %v174_v51, 2  ;;  %p435_p9 = pnand %p434_p8, %p428_p5 }
  0x1d   :  { %v177_v53 = vrot.slane %v175_v52, 2 }
  0x1f   :  { %v179_v56 = vadd.f32 %v177_v53, %v169_v42 }
  0x31   :  { %270 = vrot.lane.b32.xlu0 %v228_v8, %s474_s2 }
  0x35   :  { %255 = vperm.xlu0 %407, %v228_v8  }
  0x39   :  { %410 = vset.pattern.permute.xlu0 %v482_v36 }
  0x3a   :  { %328 = vperm.xlu0 %410, %v228_v8  }
  0xa0   :  { %v52_v12 = vpop.xlane.xlu0 %51 }
  0xa1   :  { %vm54_vm2 = vcmp.eq.f32.partialorder %v45_v4, %v52_v12  ;;  %v252_v4 = vsub.s32 1, %v550_v29 }
  0xa2   :  { %vm56_vm3 = vmand %vm54_vm2, %vm43_vm1  ;;  %vm222_vm2 = vcmask 1042432  }
  0xa3   :  { %v60_v13 = vsel %vm56_vm3, %v58_v11, 8.0  ;;  %vm224_vm3 = vcmask 1043456  }
  0xa4   :  { %v49_v14 = vpop.xlane.xlu0 %48  ;;  %v64_v15 = vsel %vm46_vm0, %v60_v13, inf }
  0xa5   :  { %vm53_vm4 = vcmp.eq.f32.partialorder %v44_v5, %v49_v14  ;;  %65 = vmin.xlane.f32.xlu1 %v64_v15 }
  0xa6   :  { %vm55_vm5 = vmand %vm53_vm4, %vm43_vm1  ;;  %vm220_vm1 = vcmask 1041408   ;;  %vm226_vm4 = vcmask 126976  }
  0xa7   :  { %v59_v16 = vsel %vm55_vm5, %v58_v11, 8.0 }
  0xa8   :  { %v61_v17 = vsel %vm46_vm0, %v59_v16, inf  ;;  %v271_v18 = vpop.permute.xlu0 %270  ;;  %vm218_vm0 = vcmask 1040384  }
  0xa9   :  { %62 = vmin.xlane.f32.xlu1 %v61_v17  ;;  %v273_v19 = vsub.f32 %v228_v8, %v271_v18 }
  0xab   :  { %v274_v21 = vadd.f32 1.0, %v273_v19 }
  0xb0   :  { %v256_v14 = vpop.permute.xlu0 %255 }
  0xba   :  { %276 = vrot.lane.b32.xlu1 %v274_v21, %s477_s4 }
  0xbe   :  { %235 = vperm.xlu1 %405, %v228_v8  }
  0xc2   :  { %406 = vset.pattern.permute.xlu1 %v480_v23 }
  0xc3   :  { %244 = vperm.xlu1 %406, %v228_v8  }
  0xc7   :  { %408 = vset.pattern.permute.xlu1 %v481_v24 }
  0xc8   :  { %264 = vperm.xlu1 %408, %v228_v8  }
  0xcc   :  { %409 = vset.pattern.permute.xlu1 %v475_v9 }
 0x12e   :  { %v66_v25 = vpop.xlane.xlu1 %65 }
 0x12f   :  { %v69_v27 = vmul.f32 4.0, %v66_v25 }
 0x131   :  { %v73_v28 = vadd.f32 4.0, %v69_v27  ;;  %vm71_vm8 = vcmp.ge.f32.partialorder %v67_v26, %v69_v27 }
 0x132   :  { %v63_v30 = vpop.xlane.xlu1 %62 }
 0x133   :  { %v68_v32 = vmul.f32 4.0, %v63_v30  ;;  %vm75_vm9 = vcmp.lt.f32.partialorder %v67_v26, %v73_v28 }
 0x134   :  { %vm77_vm10 = vmand %vm71_vm8, %vm75_vm9 }
 0x135   :  { %v72_v34 = vadd.f32 4.0, %v68_v32  ;;  %v79_v35 = vsel %vm77_vm10, %v38_v31, 0.0  ;;  %vm70_vm11 = vcmp.ge.f32.partialorder %v67_v26, %v68_v32 }
 0x136   :  { %v277_v37 = vpop.permute.xlu1 %276  ;;  %384 = vmatpush3.xpose.msk.msra.mxu0 %vm85_vm7, %v79_v35 }
 0x137   :  { %vm74_vm12 = vcmp.lt.f32.partialorder %v67_v26, %v72_v34  ;;  %v279_v39 = vmul.f32 %v277_v37, %v274_v21  ;;  %385 = vmatprep.subr.mxu0 %v476_v20 }
 0x138   :  { %vm76_vm14 = vmand %vm70_vm11, %vm74_vm12 }
 0x139   :  { %295 = vperm.xlu1 %409, %v279_v39   ;;  %v78_v40 = vsel %vm76_vm14, %v37_v38, 0.0 }
 0x13a   :  { %386 = vmatpush3.xpose.msk.msra.mxu0 %vm85_vm7, %v78_v40  ;;  %v236_v59 = vpop.permute.xlu1 %235 }
 0x13d   :  { %388 = vmatmul.mubr.msk.f32.vlgmr.msra.gmra.mxu0 %vm85_vm7, %v84_v41 }
 0x13e   :  { %v245_v5 = vpop.permute.xlu1 %244 }
 0x143   :  { %v265_v23 = vpop.permute.xlu1 %264 }
 0x1fd   :  { %v161_v46 = vpop.f32.mrf.mxu0 }
 0x1fe   :  { %v167_v47 = vmul.f32 %v166_v44, %v161_v46 }
 0x1ff   :  { %v389_v48 = vpop.f32.mrf.mxu0 }
 0x200   :  { %v185_v50 = vmul.f32 1.442695, %v167_v47  ;;  %v183_v57 = vmul.f32 %v181_v54, %v167_v47 }
 0x202   :  { %411 = vpow2.f32 %v185_v50  ;;  %v184_v61 = vadd.f32 %v183_v57, %v179_v56 }
 0x20f   :  { %v412_v55 = vpop.eup %411 }
 0x210   :  { %v187_v58 = vmul.f32 %v412_v55, %v174_v51 }
 0x212   :  { %v188_v60 = vmul.f32 0.5, %v187_v58 }
 0x214   :  { %v190_v62 = vrot.slane %v188_v60, 2 }
 0x216   :  { %v192_v1 = vsub.f32 %v184_v61, %v190_v62  ;;  %v193_v2 = vadd.f32 %v190_v62, %v184_v61 }
 0x218   :  { %v197_v6 = vmin.f32 %v192_v1, %v196_v63  ;;  %v200_v7 = vmin.f32 %v192_v1, %v199_v0  ;;  %v202_v8 = vmin.f32 %v193_v2, %v196_v63  ;;  %v204_v9 = vmin.f32 %v193_v2, %v199_v0 }
 0x21a   :  { %v198_v10 = vmax.f32 %v197_v6, 0.0  ;;  %v201_v11 = vmax.f32 %v200_v7, 0.0  ;;  %v203_v12 = vmax.f32 %v202_v8, 0.0  ;;  %v205_v13 = vmax.f32 %v204_v9, 0.0 }
 0x21c   :  { %v280_v15 = vsub.f32 %v203_v12, %v198_v10  ;;  %v232_v16 = vrot.slane %v203_v12, %v231_v3  ;;  %v242_v17 = vrot.slane %v198_v10, %v231_v3  ;;  %v253_v18 = vrot.slane %v205_v13, %v252_v4 }
 0x21d   :  { %v262_v19 = vrot.slane %v201_v11, %v252_v4  ;;  %v282_v20 = vsub.f32 %v205_v13, %v201_v11  ;;  %v207_v21 = vrot.slane %v198_v10, 7  ;;  %v210_v22 = vrot.slane %v201_v11, 7 }
 0x21e   :  { %v238_v24 = vmin.f32 %v232_v16, %v236_v59  ;;  %v247_v25 = vmax.f32 %v242_v17, %v245_v5  ;;  %v258_v26 = vmin.f32 %v253_v18, %v256_v14  ;;  %v281_v30 = vadd.f32 1.0, %v280_v15 }
 0x21f   :  { %v267_v27 = vmax.f32 %v262_v19, %v265_v23  ;;  %v283_v28 = vadd.f32 1.0, %v282_v20  ;;  %v213_v32 = vrot.slane %v203_v12, 5  ;;  %v219_v33 = vsel %vm218_vm0, 0.0, %v207_v21 }
 0x220   :  { %v248_v31 = vsub.f32 %v238_v24, %v247_v25  ;;  %v216_v36 = vrot.slane %v205_v13, 5  ;;  %v221_v37 = vsel %vm220_vm1, %v219_v33, %v210_v22 }
 0x221   :  { %v268_v34 = vsub.f32 %v258_v26, %v267_v27  ;;  %v285_v35 = vrot.slane %v283_v28, 1  ;;  %v223_v38 = vsel %vm222_vm2, %v221_v37, %v213_v32 }
 0x222   :  { %v249_v39 = vadd.f32 1.0, %v248_v31  ;;  %v225_v42 = vsel %vm224_vm3, %v223_v38, %v216_v36 }
 0x223   :  { %v269_v40 = vadd.f32 1.0, %v268_v34  ;;  %v287_v41 = vmul.f32 %v285_v35, %v281_v30  ;;  %227 = vst.msk [vmem:[#allocation5] sm:$0x1f] %vm226_vm4, %v225_v42 }
 0x225   :  { %v292_v43 = vrot.slane %v287_v41, %v231_v3 }
 0x226   :  { %438 = shalt.err (!%p435_p9)
}
 0x227   :  { %355 = dma.vmem_to_hbm [thread:$0]  %s353_s14, 128, %s589_s5, [#allocation3]   ;;  %v296_v44 = vpop.permute.xlu1 %295  ;;  %v288_v45 = vmul.f32 %v269_v40, %v249_v39  ;;  %vm300_vm5 = vcmp.gt.f32.partialorder %v249_v39, 0.0  ;;  %vm301_vm6 = vcmp.gt.f32.partialorder %v269_v40, 0.0  ;;  %vm306_vm7 = vcmask 128000   ;;  %v329_v1 = vpop.permute.xlu0 %328 }
 0x228   :  { %v298_v46 = vadd.f32 %v296_v44, %v292_v43  ;;  %vm302_vm8 = vmand %vm300_vm5, %vm301_vm6  ;;  %s485_s5 = smov [#allocation6]   ;;  %vm344_vm0 = vcmask 122880  }
 0x229   :  { %s362_s18 = sshll.u32 %s485_s5, 4  ;;  %s363_s18 = int_to_ptr.vmem [resolvable:$true] %s362_s18 }
 0x22a   :  { %v299_v47 = vsub.f32 %v298_v46, %v288_v45  ;;  %s447_s19 = scalar_lea.vmem %s363_s18, 16  ;;  %s451_s20 = scalar_lea.vmem %s363_s18, 32 }
 0x22b   :  { %p448_p10 = scmp.ne.s32.totalorder %s363_s18, %s447_s19  ;;  %p452_p11 = scmp.lt.s32.totalorder %s363_s18, %s363_s18 }
 0x22c   :  { %413 = vrcp.f32 %v299_v47  ;;  %p453_p12 = scmp.lt.s32.totalorder %s451_s20, %s447_s19 }
 0x22e   :  { %p454_p13 = por %p453_p12, %p452_p11 }
 0x230   :  { %p455_p0 = pnand %p454_p13, %p448_p10 }
 0x239   :  { %v414_v48 = vpop.eup %413 }
 0x23a   :  { %v304_v49 = vmul.f32 %v414_v48, %v288_v45 }
 0x23c   :  { %v305_v50 = vsel %vm302_vm8, %v304_v49, 0.0 }
 0x23d   :  { %v307_v51 = vsel %vm306_vm7, %v305_v50, -inf }
 0x23e   :  { %v308_v52 = vrot.slane %v307_v51, 4 }
 0x240   :  { %v309_v53 = vmax.f32 %v307_v51, %v308_v52 }
 0x242   :  { %v310_v54 = vrot.slane %v309_v53, 2 }
 0x244   :  { %v311_v55 = vmax.f32 %v309_v53, %v310_v54 }
 0x246   :  { %v312_v56 = vrot.slane %v311_v55, 1 }
 0x248   :  { %v313_v57 = vmax.f32 %v311_v55, %v312_v56 }
 0x24a   :  { %vm314_vm9 = vcmp.eq.f32.partialorder %v305_v50, %v313_v57  ;;  %vm339_vm14 = vcmp.gt.f32.partialorder %v313_v57, 0.0  ;;  %vm340_vm15 = vcmp.ge.f32.partialorder %v313_v57, 0.5 }
 0x24b   :  { %v315_v58 = vsel %vm314_vm9, %v550_v29, 6  ;;  %vm341_vm1 = vmand %vm339_vm14, %vm340_vm15 }
 0x24c   :  { %v316_v59 = vsel %vm306_vm7, %v315_v58, 2147483647 }
 0x24d   :  { %v317_v60 = vrot.slane %v316_v59, 4 }
 0x24f   :  { %vm318_vm10 = vcmp.lt.s32.totalorder %v316_v59, %v317_v60 }
 0x250   :  { %v319_v61 = vsel %vm318_vm10, %v316_v59, %v317_v60 }
 0x251   :  { %v320_v62 = vrot.slane %v319_v61, 2 }
 0x253   :  { %vm321_vm11 = vcmp.lt.s32.totalorder %v319_v61, %v320_v62 }
 0x254   :  { %v322_v63 = vsel %vm321_vm11, %v319_v61, %v320_v62 }
 0x255   :  { %v323_v0 = vrot.slane %v322_v63, 1 }
 0x257   :  { %vm324_vm12 = vcmp.lt.s32.totalorder %v322_v63, %v323_v0 }
 0x258   :  { %v325_v2 = vsel %vm324_vm12, %v322_v63, %v323_v0 }
 0x259   :  { %vm326_vm13 = vcmp.eq.s32.totalorder %v550_v29, %v325_v2 }
 0x25a   :  { %v331_v3 = vsel %vm326_vm13, %v329_v1, 0.0 }
 0x25b   :  { %v332_v4 = vsel %vm306_vm7, %v331_v3, 0.0 }
 0x25c   :  { %v333_v5 = vrot.slane %v332_v4, 4 }
 0x25e   :  { %v334_v6 = vadd.f32 %v333_v5, %v332_v4 }
 0x260   :  { %v335_v7 = vrot.slane %v334_v6, 2 }
 0x262   :  { %v336_v8 = vadd.f32 %v335_v7, %v334_v6 }
 0x264   :  { %v337_v9 = vrot.slane %v336_v8, 1 }
 0x266   :  { %v338_v10 = vadd.f32 %v337_v9, %v336_v8 }
 0x268   :  { %v390_v11 = vtrunc.f32 %v338_v10 }
 0x26a   :  { %v391_v12 = vcvt.f32.s32 %v390_v11 }
 0x26c   :  { %v343_v13 = vsel %vm341_vm1, %v391_v12, 0 }
 0x26d   :  { %345 = vst.msk [vmem:[#allocation6] sm:$0x1] %vm344_vm0, %v343_v13 }
 0x26e   :  { %458 = shalt.err (!%p455_p0)
}
 0x26f   :  { %365 = dma.vmem_to_hbm [thread:$0]  %s363_s18, 16, %s590_s6, [#allocation7]  }
 0x270   :  { %469 = dma.done.wait [#allocation3], 128  }
 0x271   :  { %470 = vsyncadd [#allocation3], 4294967168 }
 0x272   :  { %471 = dma.done.wait [#allocation7], 16  }
 0x273   :  { %472 = vsyncadd [#allocation7], 4294967280 }
 0x274   :  { %372 = vsyncpa [#allocation3], 1 }
 0x275   :  { %373 = vsyncpa [#allocation7], 1 }
 0x276   :  { %374 = vsyncpa [#allocation4], 1 }

</bundles_post_ra>
